<compile_context>
chip_gen: v7x
topology: tpu7x:2x2x1
jax: 0.10.0
libtpu: 0.0.40
codegen_flags: <defaults>
</compile_context>

<pallas_src>
import math

import jax
import jax.numpy as jnp
from jax.experimental import pallas as pl
from jax.experimental.pallas import tpu as pltpu


# Conservative per-input-buffer VMEM budget (Pallas double-buffers it), safe
# under the default scoped VMEM limits of v5e (16 MiB), v6e (32 MiB) and
# v7x (32 MiB).  Raise toward ~8-16 MiB on v6e if desired.
_VMEM_BUDGET_PER_BUF = 4 * 1024 * 1024


def dct_spatial_pooling(channel: int, height: int, width: int) -> jnp.ndarray:
    """Deterministic reproduction of the module's buffer init (no checkpoint)."""
    # dct_1d_weight[freq, :, :] = sum_i cos(pi*freq*(i+0.5)/C) / sqrt(C)
    freq = jnp.arange(channel, dtype=jnp.float32)[:, None]
    i = jnp.arange(channel, dtype=jnp.float32)[None, :]
    per_freq = jnp.sum(
        jnp.cos(jnp.pi * freq * (i + 0.5) / channel) / math.sqrt(channel), axis=1
    )  # (C,)
    return jnp.broadcast_to(per_freq[:, None, None], (channel, height, width)).astype(
        jnp.float32
    )


def _largest_divisor_tile(extent: int, quantum: int, cap: int) -> int:
    """Largest t dividing `extent` with t % quantum == 0 and t <= cap.

    Falls back to the full extent (always a legal block) when `extent` is not
    a multiple of `quantum`.
    """
    if extent % quantum != 0:
        return extent
    if extent <= cap:
        return extent
    best = quantum
    t = quantum
    limit = min(extent, cap)
    while t <= limit:
        if extent % t == 0:
            best = t
        t += quantum
    return best


def _dct_pool_kernel(w_ref, x_ref, o_ref):
    # w_ref: (C,) f32 in SMEM; x_ref: (Bt, C, THW) in VMEM; o_ref: (Bt, THW).
    n_ch = x_ref.shape[1]
    # Stream the channel reduction: one f32 (Bt, THW) accumulator and one
    # channel slice live at a time -- no (Bt, C, THW) temporary, and the
    # per-channel weights are scalar SMEM reads broadcast by the VPU.
    acc = w_ref[0] * x_ref[:, 0, :].astype(jnp.float32)
    for c in range(1, n_ch):  # static unroll; C is fixed at trace time
        acc = acc + w_ref[c] * x_ref[:, c, :].astype(jnp.float32)
    o_ref[...] = acc.astype(o_ref.dtype)


def dct_1d_pooling(x: jnp.ndarray, weight: jnp.ndarray) -> jnp.ndarray:
    """x: (B, C, H, W) NCHW, weight: (C, H, W). Returns (B, 1, H, W)."""
    B, C, H, W = x.shape
    HW = H * W
    itemsize = jnp.dtype(x.dtype).itemsize

    x2 = x.reshape(B, C, HW)  # contiguous reshape, free
    # The module's buffer is constant across (H, W) by construction, so only
    # the per-channel vector is needed in the kernel (kept in SMEM).
    w_vec = weight[:, 0, 0].astype(jnp.float32)

    # Tile selection: sublane-dense batch rows, lane-dense HW tiles.
    bt = _largest_divisor_tile(B, 8, 64)
    lane_cap = max(128, (_VMEM_BUDGET_PER_BUF // (bt * C * itemsize)) // 128 * 128)
    thw = _largest_divisor_tile(HW, 128, lane_cap)
    # Give the second TensorCore (v7x megacore) work if the grid would
    # otherwise collapse to a single step.
    if B // bt == 1 and HW // thw == 1 and thw % 256 == 0:
        thw //= 2

    grid = (B // bt, HW // thw)

    out = pl.pallas_call(
        _dct_pool_kernel,
        out_shape=jax.ShapeDtypeStruct((B, HW), x.dtype),
        grid=grid,
        in_specs=[
            # per-channel weights: whole (C,) vector in SMEM, never re-DMAed
            pl.BlockSpec(memory_space=pltpu.MemorySpace.SMEM),
            # x tile: (Bt, C, THW); C kept at full extent, THW lane-dense
            pl.BlockSpec((bt, C, thw), lambda bi, hi: (bi, 0, hi)),
        ],
        # 2-D, lane-dense output slab; reshaped to (B, 1, H, W) outside
        out_specs=pl.BlockSpec((bt, thw), lambda bi, hi: (bi, hi)),
        compiler_params=pltpu.CompilerParams(
            dimension_semantics=("parallel", "parallel")
        ),
    )(w_vec, x2)

    return out.reshape(B, 1, H, W)


if __name__ == "__main__":
    B, C, H, W = 2, 4, 16, 16
    key = jax.random.PRNGKey(0)
    x = jax.random.normal(key, (B, C, H, W), dtype=jnp.float32)

    weight = dct_spatial_pooling(C, H, W)

    result = dct_1d_pooling(x, weight)
    result = jax.block_until_ready(result)

    # sanity check against plain-JAX reference of the forward pass
    ref = jnp.sum(x * weight[None], axis=1, keepdims=True)
    assert result.shape == (B, 1, H, W)
    assert jnp.allclose(result, ref, atol=1e-5, rtol=1e-5)

    print("KERNEL_OK")
</pallas_src>

<mosaic_0001>
module attributes {stable_mosaic.version = 11 : i64} {
  func.func @_dct_pool_kernel(%arg0: i32, %arg1: i32, %arg2: memref<4xf32, #tpu.memory_space<smem>>, %arg3: memref<2x4x128xf32, #tpu.memory_space<vmem>>, %arg4: memref<2x128xf32, #tpu.memory_space<vmem>>) attributes {dimension_semantics = [#tpu.dimension_semantics<parallel>, #tpu.dimension_semantics<parallel>], iteration_bounds = array<i64: 1, 2>, scalar_prefetch = 0 : i64, scratch_operands = 0 : i64, tpu.core_type = #tpu.core_type<tc>, window_params = [{transform_indices = @transform_0, window_bounds = array<i64: 4>}, {transform_indices = @transform_1, window_bounds = array<i64: 2, 4, 128>}, {transform_indices = @transform_2, window_bounds = array<i64: 2, 128>}]} {
    %c0 = arith.constant 0 : index
    %0 = memref.load %arg2[%c0] : memref<4xf32, #tpu.memory_space<smem>>
    %c0_0 = arith.constant 0 : index
    %c0_1 = arith.constant 0 : index
    %c0_2 = arith.constant 0 : index
    %1 = vector.load %arg3[%c0_0, %c0_1, %c0_2] : memref<2x4x128xf32, #tpu.memory_space<vmem>>, vector<2x1x128xf32>
    %2 = vector.shape_cast %1 : vector<2x1x128xf32> to vector<2x128xf32>
    %3 = vector.broadcast %0 : f32 to vector<2x128xf32>
    %4 = arith.mulf %3, %2 : vector<2x128xf32>
    %c1 = arith.constant 1 : index
    %5 = memref.load %arg2[%c1] : memref<4xf32, #tpu.memory_space<smem>>
    %c0_3 = arith.constant 0 : index
    %c1_4 = arith.constant 1 : index
    %c0_5 = arith.constant 0 : index
    %6 = vector.load %arg3[%c0_3, %c1_4, %c0_5] : memref<2x4x128xf32, #tpu.memory_space<vmem>>, vector<2x1x128xf32>
    %7 = vector.shape_cast %6 : vector<2x1x128xf32> to vector<2x128xf32>
    %8 = vector.broadcast %5 : f32 to vector<2x128xf32>
    %9 = arith.mulf %8, %7 : vector<2x128xf32>
    %10 = arith.addf %4, %9 : vector<2x128xf32>
    %c2 = arith.constant 2 : index
    %11 = memref.load %arg2[%c2] : memref<4xf32, #tpu.memory_space<smem>>
    %c0_6 = arith.constant 0 : index
    %c2_7 = arith.constant 2 : index
    %c0_8 = arith.constant 0 : index
    %12 = vector.load %arg3[%c0_6, %c2_7, %c0_8] : memref<2x4x128xf32, #tpu.memory_space<vmem>>, vector<2x1x128xf32>
    %13 = vector.shape_cast %12 : vector<2x1x128xf32> to vector<2x128xf32>
    %14 = vector.broadcast %11 : f32 to vector<2x128xf32>
    %15 = arith.mulf %14, %13 : vector<2x128xf32>
    %16 = arith.addf %10, %15 : vector<2x128xf32>
    %c3 = arith.constant 3 : index
    %17 = memref.load %arg2[%c3] : memref<4xf32, #tpu.memory_space<smem>>
    %c0_9 = arith.constant 0 : index
    %c3_10 = arith.constant 3 : index
    %c0_11 = arith.constant 0 : index
    %18 = vector.load %arg3[%c0_9, %c3_10, %c0_11] : memref<2x4x128xf32, #tpu.memory_space<vmem>>, vector<2x1x128xf32>
    %19 = vector.shape_cast %18 : vector<2x1x128xf32> to vector<2x128xf32>
    %20 = vector.broadcast %17 : f32 to vector<2x128xf32>
    %21 = arith.mulf %20, %19 : vector<2x128xf32>
    %22 = arith.addf %16, %21 : vector<2x128xf32>
    %c0_12 = arith.constant 0 : index
    %c0_13 = arith.constant 0 : index
    %23 = vector.load %arg4[%c0_12, %c0_13] : memref<2x128xf32, #tpu.memory_space<vmem>>, vector<2x128xf32>
    tpu.vector_store %arg4[%c0_12, %c0_13], %22 {strides = array<i32>} : memref<2x128xf32, #tpu.memory_space<vmem>>, vector<2x128xf32>,
    return
  }
  func.func @transform_0(%arg0: i32, %arg1: i32) -> i32 {
    %c0_i32 = arith.constant 0 : i32
    %c0_i32_0 = arith.constant 0 : i32
    return %c0_i32 : i32
  }
  func.func @transform_1(%arg0: i32, %arg1: i32) -> (i32, i32, i32) {
    %c0_i32 = arith.constant 0 : i32
    %c0_i32_0 = arith.constant 0 : i32
    return %arg0, %c0_i32, %arg1 : i32, i32, i32
  }
  func.func @transform_2(%arg0: i32, %arg1: i32) -> (i32, i32) {
    %c0_i32 = arith.constant 0 : i32
    return %arg0, %arg1 : i32, i32
  }
}

</mosaic_0001>

<bundles_post_ra>
// kernel: tpu_custom_call.1
= control target key start
LH: loop header
LB: loop body
LE: loop exit
PB: predicated region body
PF: predicated region fallthrough
CT: control target
= control target key end

     0   :  { %7 = vsyncpa [#allocation5], 0  ;;  %s786_s0 = inlined_call_operand.hbm [shape: f32[4], index: 0, kind: input, shape index: {}]   ;;  %s787_s1 = inlined_call_operand.hbm [shape: f32[2,4,256], index: 1, kind: input, shape index: {}]   ;;  %s788_s2 = inlined_call_operand.hbm [shape: f32[2,256], index: 2, kind: output, shape index: {}]  }
   0x1   :  { %8 = vsyncpa [#allocation3], 0 }
   0x2   :  { %10 = vsyncpa [#allocation3 + $0x1], 0 }
   0x3   :  { %11 = vsyncpa [#allocation4], 0 }
   0x4   :  { %13 = vsyncpa [#allocation4 + $0x1], 0  ;;  %s586_s9 = smov 0   ;;  %s588_s10 = smov 0  }
   0x5   :  { %s590_s11 = smov 0   ;;  %s592_s12 = smov 0  }
   0x6   :  { %s594_s13 = smov 0   ;;  %s596_s14 = smov 0  }
   0x7 LB: > { %s340_s15 = sadd.s32 4294967295, %s563_s14   ;;  %s341_s16 = sadd.s32 4294967294, %s563_s14   ;;  %s563_s14 = sphi %s596_s14, %s19_s14   ;;  %s559_s13 = sphi %s594_s13, %s808_s13   ;;  %s555_s12 = sphi %s592_s12, %s807_s12   ;;  %s551_s11 = sphi %s590_s11, %s806_s11   ;;  %s547_s10 = sphi %s588_s10, %s805_s10   ;;  %s543_s9 = sphi %s586_s9, %s804_s9  }
   0x8   : > { %s61_s17 = sadd.s32 1, %s551_s11  ;;  %p68_p0 = scmp.ne.s32.totalorder %s551_s11, %s547_s10 }
   0x9   : > { %p69_p1 = scmp.eq.s32.totalorder %s563_s14, 0  ;;  %p74_p2 = scmp.ne.s32.totalorder %s547_s10, %s543_s9 }
   0xa   : > { %p624_p3 = scmp.eq.s32.totalorder %s340_s15, 0  ;;  %p100_p4 = scmp.eq.s32.totalorder %s340_s15, 1 }
   0xb   : > { %p70_p5 = por %p69_p1, %p68_p0  ;;  %p106_p6 = scmp.eq.s32.totalorder %s341_s16, 1 }
   0xc   : > { %s793_s18 = scalar_select %p624_p3, 1, 0 }
   0xd   : > { %p630_p7 = por %p624_p3, %p74_p2  ;;  %p634_p8 = por %p100_p4, %p68_p0 }
   0xe   : > { %p638_p9 = por %p106_p6, %p74_p2  ;;  %p342_p10 = scmp.ge.s32.totalorder %s563_s14, 1 }
   0xf   : > { %s794_s19 = scalar_select %p630_p7, 1, 0 }
  0x10   : > { %s795_s20 = scalar_select %p634_p8, 1, 0 }
  0x11   : > { %s796_s21 = scalar_select %p638_p9, 1, 0 }
  0x12   : > { %p113_p11 = scmp.lt.s32.totalorder %s563_s14, 3  ;;  %p379_p1 = scmp.lt.s32.totalorder %s563_s14, 2 }
  0x13   : > { %s135_s23 = sand.u32 1, %s551_s11   ;;  %s28_s25 = sadd.s32 1, %s559_s13 }
  0x14   : > { %p645_p13 = pnand %p342_p10, %p113_p11  ;;  %p653_p0 = pnand %p379_p1, %p70_p5 }
  0x15   : > { %s345_s26 = sshll.u32 %s135_s23, 3  ;;  %p29_p4 = scmp.ge.s32.totalorder %s28_s25, 2 }
  0x16   : > { %p366_p7 = pneg %p645_p13  ;;  %s434_s29 = scalar_lea.hbm %s786_s0, 16 }
  0x17   : > { %p435_p6 = scmp.ne.s32.totalorder %s786_s0, %s434_s29  ;;  %p441_p5 = scmp.lt.u32.totalorder %s434_s29, %s786_s0 }
  0x18   : > { %p367_p2 = pnand %p366_p7, %p624_p3 }
  0x1a   : > { %p436_p10 = pneg %p367_p2 }
  0x1c   : > { %p437_p11 = pnand %p436_p10, %p435_p6 }
  0x1e   : > { %p438_p12 = pneg %p437_p11 }
  0x20   : > { %p443_p1 = pnand %p441_p5, %p438_p12 }
  0x22   : > { %446 = shalt.err (!%p443_p1)
}
  0x23   : > { %s565_s6 = smov [#allocation2]   ;;  %s810_s25 = smov (%p29_p4, %s28_s25), 0 }
  0x24   : > { %369 = dma.hbm_to_smem (!%p367_p2), %s786_s0, 16, %s565_s6, [#allocation5]  }
  0x25   : > { %s346_s15 = sshll.u32 %s559_s13, 6  ;;  %s57_s16 = ssub.s32 %s559_s13, %s810_s25 }
  0x26   : > { %s680_s29 = scalar_lea.hbm %s787_s1, %s346_s15  ;;  %p59_p7 = scmp.eq.s32.totalorder %s57_s16, 0 }
  0x27   : > { %s139_s30 = scalar_lea.vmem [#allocation6], %s345_s26  ;;  %s689_s5 = scalar_lea.sflag [#allocation3], %s135_s23 }
  0x28   : > { %s148_s3 = sshll.u32 %s139_s30, 4  ;;  %s447_s6 = scalar_lea.hbm %s680_s29, 128  ;;  %s682_s3 = int_to_ptr.vmem [resolvable:$true] %s148_s3 }
  0x29   : > { %s687_s4 = scalar_select %p59_p7, %s551_s11, %s61_s17  }
  0x2a   : > { %p448_p12 = scmp.ne.s32.totalorder %s680_s29, %s447_s6  ;;  %p449_p2 = pneg %p653_p0 }
  0x2b   : > { %s452_s26 = scalar_lea.hbm %s787_s1, 256  ;;  %p453_p10 = scmp.lt.u32.totalorder %s680_s29, %s787_s1 }
  0x2c   : > { %p450_p4 = pnand %p449_p2, %p448_p12  ;;  %p454_p11 = scmp.lt.u32.totalorder %s452_s26, %s447_s6 }
  0x2d   : > { %p456_p1 = scmp.lt.u32.totalorder %s447_s6, %s680_s29 }
  0x2e   : > { %p451_p6 = pneg %p450_p4  ;;  %p455_p5 = por %p454_p11, %p453_p10 }
  0x30   : > { %p457_p7 = por %p456_p1, %p455_p5 }
  0x32   : > { %p458_p9 = pnand %p457_p7, %p451_p6 }
  0x34   : > { %461 = shalt.err (!%p458_p9)
}
  0x35   : > { %s462_s17 = scalar_lea.vmem %s682_s3, 128  ;;  %s566_s23 = smov [#allocation6]  }
  0x36   : > { %p463_p12 = scmp.ne.s32.totalorder %s682_s3, %s462_s17  ;;  %s467_s27 = sshll.u32 %s566_s23, 4  ;;  %s468_s27 = int_to_ptr.vmem [resolvable:$false] %s467_s27 }
  0x37   : > { %s469_s28 = scalar_lea.vmem %s468_s27, 256  ;;  %p470_p3 = scmp.lt.s32.totalorder %s682_s3, %s468_s27 }
  0x38   : > { %p465_p4 = pnand %p463_p12, %p449_p2  ;;  %p471_p10 = scmp.lt.s32.totalorder %s469_s28, %s462_s17 }
  0x3a   : > { %p466_p8 = pneg %p465_p4  ;;  %p472_p11 = por %p471_p10, %p470_p3 }
  0x3c   : > { %p473_p5 = pnand %p472_p11, %p466_p8 }
  0x3e   : > { %476 = shalt.err (!%p473_p5)
}
  0x3f   : > { %s567_s30 = smov 128   ;;  %s568_s6 = smov 64  }
  0x40   : > { %s569_s7 = smov 4   ;;  %160 = sbr.rel (%p645_p13) target bundleno = 110 (0x6e), region = 28 }
  0x41   : > { %373 = dma.hbm_to_vmem [thread:$0]  (!%p653_p0), %s680_s29, 128, %s682_s3, %s689_s5, %s567_s30, %s568_s6, %s569_s7  }
  0x42   : > { %p799_p9 = scmp.ne.s32.totalorder (!%p645_p13), %s793_s18, 0 }
  0x47   : > { %530 = dma.done.wait (%p799_p9), [#allocation5], 16  }
  0x48   : > { %532 = vsyncadd (%p799_p9), [#allocation5], 4294967280  ;;  %s724_s8 = sand.u32 1, %s547_s10   ;;  %p800_p3 = scmp.ne.s32.totalorder %s794_s19, 0 }
  0x49   : > { %s349_s26 = sshll.u32 %s724_s8, 3  ;;  %s167_s15 = scalar_lea.sflag [#allocation3], %s724_s8 }
  0x4a   : > { %s170_s16 = scalar_lea.vmem [#allocation6], %s349_s26 }
  0x4b   : > { %534 = dma.done.wait (%p800_p3), %s167_s15, 128  }
  0x4c   : > { %536 = vsyncadd (%p800_p3), %s167_s15, 4294967168 }
  0x4d   : > { %175 = sfence }
  0x4e   : > { %s193_s22 = sld [smem:[#allocation2]]  ;;  %s351_s24 = sld [smem:[#allocation2 + $0x1]]  ;;  %v194_v0 = vld [vmem:[%s170_s16] sm:$0x1]  ;;  %v195_v1 = vld [vmem:[%s170_s16 + $0x4] sm:$0x1] }
  0x4f   : > { %s352_s18 = sld [smem:[#allocation2 + $0x2]]  ;;  %s353_s29 = sld [smem:[#allocation2 + $0x3]]  ;;  %v200_v2 = vld [vmem:[%s170_s16 + $0x1] sm:$0x1]  ;;  %v201_v3 = vld [vmem:[%s170_s16 + $0x5] sm:$0x1] }
  0x50   : > { %v208_v5 = vld [vmem:[%s170_s16 + $0x2] sm:$0x1]  ;;  %v209_v6 = vld [vmem:[%s170_s16 + $0x6] sm:$0x1]  ;;  %v216_v10 = vld [vmem:[%s170_s16 + $0x3] sm:$0x1] }
  0x51   : > { %v217_v11 = vld [vmem:[%s170_s16 + $0x7] sm:$0x1]  ;;  %s350_s19 = sshll.u32 %s724_s8, 1  ;;  %s355_s17 = sshll.u32 %s555_s12, 5  ;;  %vm226_vm0 = vcmask 1041409  }
  0x52   : > { %s191_s3 = scalar_lea.vmem [#allocation7], %s350_s19  ;;  %s739_s28 = scalar_lea.hbm %s788_s2, %s355_s17 }
  0x53   : > { %s246_s5 = sshll.u32 %s191_s3, 4  ;;  %s231_s30 = scalar_lea.sflag [#allocation4], %s724_s8  ;;  %s734_s5 = int_to_ptr.vmem [resolvable:$true] %s246_s5 }
  0x54   : > { %v196_v4 = vstv %s193_s22  ;;  %v202_v9 = vstv %s351_s24  ;;  %s477_s6 = scalar_lea.vmem %s734_s5, 32  ;;  %p801_p13 = scmp.ne.s32.totalorder %s795_s20, 0 }
  0x55   : > { %v197_v7 = vmul.f32 %v196_v4, %v194_v0  ;;  %v198_v8 = vmul.f32 %v196_v4, %v195_v1  ;;  %v203_v12 = vmul.f32 %v202_v9, %v200_v2  ;;  %v204_v13 = vmul.f32 %v202_v9, %v201_v3  ;;  %p478_p8 = scmp.ne.s32.totalorder %s734_s5, %s477_s6  ;;  %s570_s12 = smov [#allocation7]  }
  0x56   : > { %v210_v14 = vstv %s352_s18  ;;  %v218_v17 = vstv %s353_s29  ;;  %s481_s7 = sshll.u32 %s570_s12, 4  ;;  %s482_s7 = int_to_ptr.vmem [resolvable:$false] %s481_s7 }
  0x57   : > { %v211_v15 = vmul.f32 %v210_v14, %v208_v5  ;;  %v212_v16 = vmul.f32 %v210_v14, %v209_v6  ;;  %v205_v18 = vadd.f32 %v203_v12, %v197_v7  ;;  %v206_v19 = vadd.f32 %v204_v13, %v198_v8  ;;  %p479_p0 = pnand %p478_p8, %p801_p13  ;;  %s483_s26 = scalar_lea.vmem %s482_s7, 64 }
  0x58   : > { %v219_v20 = vmul.f32 %v218_v17, %v216_v10  ;;  %v220_v21 = vmul.f32 %v218_v17, %v217_v11  ;;  %p484_p6 = scmp.lt.s32.totalorder %s734_s5, %s482_s7  ;;  %p485_p1 = scmp.lt.s32.totalorder %s483_s26, %s477_s6 }
  0x59   : > { %v213_v22 = vadd.f32 %v211_v15, %v205_v18  ;;  %v214_v23 = vadd.f32 %v212_v16, %v206_v19  ;;  %p480_p2 = pneg %p479_p0 }
  0x5a   : > { %p486_p7 = por %p485_p1, %p484_p6 }
  0x5b   : > { %v221_v24 = vadd.f32 %v219_v20, %v213_v22  ;;  %v222_v25 = vadd.f32 %v220_v21, %v214_v23 }
  0x5c   : > { %p487_p12 = pnand %p486_p7, %p480_p2 }
  0x5d   : > { %v225_v26 = vrot.slane %v222_v25, 7 }
  0x5f   : > { %v227_v27 = vsel %vm226_vm0, %v225_v26, %v221_v24 }
  0x60   : > { %229 = vst [vmem:[%s191_s3] sm:$0x3] %v227_v27 }
  0x61   : > { %490 = shalt.err (!%p487_p12)
}
  0x62   : > { %s491_s8 = scalar_lea.hbm %s739_s28, 32  ;;  %s495_s22 = scalar_lea.hbm %s788_s2, 64 }
  0x63   : > { %p492_p4 = scmp.ne.s32.totalorder %s739_s28, %s491_s8  ;;  %p496_p5 = scmp.lt.u32.totalorder %s739_s28, %s788_s2 }
  0x64   : > { %p497_p9 = scmp.lt.u32.totalorder %s495_s22, %s491_s8  ;;  %p499_p8 = scmp.lt.u32.totalorder %s491_s8, %s739_s28 }
  0x65   : > { %p493_p10 = pnand %p492_p4, %p801_p13 }
  0x66   : > { %p498_p3 = por %p497_p9, %p496_p5 }
  0x67   : > { %p494_p11 = pneg %p493_p10 }
  0x68   : > { %p500_p0 = por %p499_p8, %p498_p3 }
  0x6a   : > { %p501_p2 = pnand %p500_p0, %p494_p11 }
  0x6c   : > { %504 = shalt.err (!%p501_p2)
}
  0x6d   : > { %364 = dma.vmem_to_hbm [thread:$0]  (%p801_p13), %s734_s5, 32, %s739_s28, %s231_s30  }
  0x6e PF: > { %s258_s29 = sand.u32 1, %s543_s9   ;;  %p802_p6 = scmp.ne.s32.totalorder %s796_s21, 0 }
  0x6f   : > { %p803_p1 = scmp.ge.s32.totalorder %s563_s14, 2  ;;  %s259_s19 = scalar_lea.sflag [#allocation4], %s258_s29 }
  0x71   : > { %p375_p7 = pnand %p803_p1, %p802_p6 }
  0x73   : > { %538 = dma.done.wait (!%p375_p7), %s259_s19, 32  }
  0x74   : > { %540 = vsyncadd (!%p375_p7), %s259_s19, 4294967264  ;;  %s19_s14 = sadd.s32 1, %s563_s14   ;;  %s804_s9 = smov %s547_s10 }
  0x75   : > { %p16_p12 = scmp.ge.s32.totalorder %s19_s14, 4   ;;  %s805_s10 = smov %s551_s11 }
  0x76   : > { %s806_s11 = smov %s687_s4  ;;  %s807_s12 = smov %s559_s13 }
  0x77   : > { %s808_s13 = smov %s810_s25  ;;  %18 = sbr.rel (!%p16_p12) target bundleno = 7 (0x7), region = 78 }
  0x7e   :  { %264 = vsyncpa [#allocation3], 1 }
  0x7f   :  { %266 = vsyncpa [#allocation3 + $0x1], 1 }
  0x80   :  { %267 = vsyncpa [#allocation4], 1 }
  0x81   :  { %269 = vsyncpa [#allocation4 + $0x1], 1 }
  0x82   :  { %270 = vsyncpa [#allocation5], 1 }
  0x83   :  { %272 = vsyncpa [#allocation5 + $0x1], 1 }

</bundles_post_ra>
